<compile_context>
chip_gen: v6e
topology: v6e:2x2x1
jax: 0.10.0
libtpu: 0.0.40
codegen_flags: <defaults>
</compile_context>

<pallas_src>
import jax
import jax.numpy as jnp
from jax.experimental import pallas as pl
from jax.experimental.pallas import tpu as pltpu


def _round_up(x, m):
    return ((x + m - 1) // m) * m


def _sublane_multiple(dtype):
    itemsize = jnp.dtype(dtype).itemsize
    return {4: 8, 2: 16, 1: 32}.get(itemsize, 8)


def _chip_vmem_bytes():
    """Per-TensorCore VMEM capacity; conservative (v7x-sized) fallback."""
    try:
        return int(pltpu.get_tpu_info().vmem_capacity_bytes)
    except Exception:
        pass
    try:
        kind = jax.devices()[0].device_kind.lower()
    except Exception:
        return 64 << 20
    if "v5" in kind or "v6" in kind:
        return 128 << 20
    return 64 << 20


def _blender_kernel(coef_ref, d_ref, o_ref):
    """coef_ref: (TBP, S)     f32 softmax coefficients (one row per (b, p) slab).
       d_ref:    (S, TBP, THW) data block for the current grid step.
       o_ref:    (TBP, THW)    output block."""
    S = d_ref.shape[0]

    def term(s):
        d = d_ref[s]                              # (TBP, THW)
        if d.dtype != jnp.float32:                # only cast when input is not f32
            d = d.astype(jnp.float32)
        return coef_ref[:, s:s + 1] * d           # (TBP, 1) broadcast over lanes

    # Streaming accumulation over S (S is small and static -> unrolled).
    acc = term(0)
    for s in range(1, S):
        acc = acc + term(s)
    o_ref[...] = acc.astype(o_ref.dtype)


def blender_profiles(x_param, data):
    """x_param: (S, 1, P, 1, 1), data: (S, B, P, H, W).
       Returns (B, P, H, W) = sum_s softmax(x_param, axis=0)[s] * data[s]."""
    S, B, P, H, W = data.shape
    BP, HW = B * P, H * W
    itemsize = jnp.dtype(data.dtype).itemsize
    align = _sublane_multiple(data.dtype)

    # ---- chip-aware block budget / VMEM cap ---------------------------------
    chip_vmem = _chip_vmem_bytes()
    if chip_vmem <= (64 << 20):          # v7x-class: 64 MiB VMEM per TensorCore
        budget = 12 << 20
        vmem_cap = 56 << 20
    else:                                # v5e / v6e: 128 MiB VMEM
        budget = 16 << 20
        vmem_cap = 100 << 20

    # ---- hoisted coefficient computation (tiny, runs once, kept in f32) -----
    coef = jax.nn.softmax(x_param.reshape(S, P).astype(jnp.float32), axis=0)   # (S, P)
    # Row g = b*P + p of coef_bp holds softmax column p (matches flatten order).
    coef_bp = jnp.broadcast_to(coef.T[None], (B, P, S)).reshape(BP, S)          # (BP, S)

    # ---- lane-dense flattening + pad HW to a multiple of 128 ----------------
    HW_p = _round_up(HW, 128)
    data_f = data.reshape(S, BP, HW)
    if HW_p != HW:
        data_f = jnp.pad(data_f, ((0, 0), (0, 0), (0, HW_p - HW)))

    # ---- block-size selection (cdiv tiling, no exact-divisor requirement) ----
    min_rows = BP if BP <= align else align
    if S * min_rows * HW_p * itemsize <= budget:
        thw = HW_p                                   # full-HW blocks (common case)
    else:
        thw = max(128, (budget // (S * min_rows * itemsize)) // 128 * 128)
        thw = min(thw, HW_p)
    n_hw = pl.cdiv(HW_p, thw)

    if BP <= align:
        tbp = BP                                     # full-dim block (always legal)
    else:
        rows_fit = max(1, budget // (S * thw * itemsize))
        tbp = max(align, (rows_fit // align) * align)
        if n_hw == 1:
            # Megacore: guarantee >= 2 grid steps so v7x's 2nd TC gets work.
            tbp = min(tbp, _round_up(pl.cdiv(BP, 2), align))
        tbp = min(tbp, BP)
    n_bp = pl.cdiv(BP, tbp)
    grid = (n_bp, n_hw)

    # ---- VMEM limit / cost hint ----------------------------------------------
    data_block = S * tbp * thw * itemsize
    out_block = tbp * thw * itemsize
    coef_block = _round_up(tbp, 8) * max(128, _round_up(S, 128)) * 4
    needed = 2 * (data_block + out_block + coef_block) + (4 << 20)
    vmem_limit = int(min(vmem_cap, max(32 << 20, needed)))
    # TODO(synk): if a single minimal block ever exceeds vmem_cap (gigantic S*HW),
    # add an S grid axis with an accumulator; not needed for realistic shapes.

    cost = pl.CostEstimate(
        flops=2 * S * BP * HW,
        transcendentals=0,
        bytes_accessed=(S * BP * HW + BP * HW) * itemsize + BP * S * 4,
    )

    out_flat = pl.pallas_call(
        _blender_kernel,
        out_shape=jax.ShapeDtypeStruct((BP, HW_p), data.dtype),
        grid_spec=pltpu.PrefetchScalarGridSpec(
            num_scalar_prefetch=0,
            grid=grid,
            in_specs=[
                pl.BlockSpec((tbp, S), lambda g, h: (g, 0)),           # coefficients
                pl.BlockSpec((S, tbp, thw), lambda g, h: (0, g, h)),   # data slabs
            ],
            out_specs=pl.BlockSpec((tbp, thw), lambda g, h: (g, h)),
        ),
        compiler_params=pltpu.CompilerParams(
            dimension_semantics=("parallel", "parallel"),
            vmem_limit_bytes=vmem_limit,
        ),
        cost_estimate=cost,
    )(coef_bp, data_f)

    if HW_p != HW:
        out_flat = out_flat[:, :HW]
    return out_flat.reshape(B, P, H, W)


if __name__ == "__main__":
    # Small shapes: S profiles to blend, batch B, channels P, spatial H x W.
    S, B, P, H, W = 4, 2, 4, 8, 128
    key = jax.random.PRNGKey(0)
    kx, kd = jax.random.split(key)

    # PyTorch __init__ uses ones; add a deterministic perturbation so the softmax
    # (and the blend) is non-trivial for the correctness check.
    x_param = jnp.ones((S, 1, P, 1, 1), jnp.float32) \
        + 0.5 * jax.random.normal(kx, (S, 1, P, 1, 1), jnp.float32)
    data = jax.random.normal(kd, (S, B, P, H, W), jnp.float32)

    out = blender_profiles(x_param, data)
    out = jax.block_until_ready(out)

    # Pure-JAX reference of the PyTorch forward.
    coef_ref = jax.nn.softmax(x_param, axis=0)                 # (S,1,P,1,1)
    expected = jnp.sum(coef_ref * data, axis=0)                # (B,P,H,W)

    assert out.shape == (B, P, H, W)
    assert jnp.allclose(out, expected, atol=1e-5, rtol=1e-5), "mismatch vs reference"
    print("KERNEL_OK")
</pallas_src>

<mosaic_0001>
module attributes {stable_mosaic.version = 11 : i64} {
  func.func @_blender_kernel(%arg0: i32, %arg1: i32, %arg2: memref<8x4xf32, #tpu.memory_space<vmem>>, %arg3: memref<4x8x1024xf32, #tpu.memory_space<vmem>>, %arg4: memref<8x1024xf32, #tpu.memory_space<vmem>>) attributes {dimension_semantics = [#tpu.dimension_semantics<parallel>, #tpu.dimension_semantics<parallel>], iteration_bounds = array<i64: 1, 1>, scalar_prefetch = 0 : i64, scratch_operands = 0 : i64, tpu.core_type = #tpu.core_type<tc>, window_params = [{transform_indices = @transform_0, window_bounds = array<i64: 8, 4>}, {transform_indices = @transform_1, window_bounds = array<i64: 4, 8, 1024>}, {transform_indices = @transform_2, window_bounds = array<i64: 8, 1024>}]} {
    %c0 = arith.constant 0 : index
    %c0_0 = arith.constant 0 : index
    %c0_1 = arith.constant 0 : index
    %0 = vector.load %arg3[%c0, %c0_0, %c0_1] : memref<4x8x1024xf32, #tpu.memory_space<vmem>>, vector<1x8x1024xf32>
    %1 = vector.shape_cast %0 : vector<1x8x1024xf32> to vector<8x1024xf32>
    %c0_2 = arith.constant 0 : index
    %c0_3 = arith.constant 0 : index
    %2 = vector.load %arg2[%c0_2, %c0_3] : memref<8x4xf32, #tpu.memory_space<vmem>>, vector<8x1xf32>
    %3 = vector.broadcast %2 : vector<8x1xf32> to vector<8x1024xf32>
    %4 = arith.mulf %3, %1 : vector<8x1024xf32>
    %c1 = arith.constant 1 : index
    %c0_4 = arith.constant 0 : index
    %c0_5 = arith.constant 0 : index
    %5 = vector.load %arg3[%c1, %c0_4, %c0_5] : memref<4x8x1024xf32, #tpu.memory_space<vmem>>, vector<1x8x1024xf32>
    %6 = vector.shape_cast %5 : vector<1x8x1024xf32> to vector<8x1024xf32>
    %c0_6 = arith.constant 0 : index
    %c1_7 = arith.constant 1 : index
    %7 = vector.load %arg2[%c0_6, %c1_7] : memref<8x4xf32, #tpu.memory_space<vmem>>, vector<8x1xf32>
    %8 = vector.broadcast %7 : vector<8x1xf32> to vector<8x1024xf32>
    %9 = arith.mulf %8, %6 : vector<8x1024xf32>
    %10 = arith.addf %4, %9 : vector<8x1024xf32>
    %c2 = arith.constant 2 : index
    %c0_8 = arith.constant 0 : index
    %c0_9 = arith.constant 0 : index
    %11 = vector.load %arg3[%c2, %c0_8, %c0_9] : memref<4x8x1024xf32, #tpu.memory_space<vmem>>, vector<1x8x1024xf32>
    %12 = vector.shape_cast %11 : vector<1x8x1024xf32> to vector<8x1024xf32>
    %c0_10 = arith.constant 0 : index
    %c2_11 = arith.constant 2 : index
    %13 = vector.load %arg2[%c0_10, %c2_11] : memref<8x4xf32, #tpu.memory_space<vmem>>, vector<8x1xf32>
    %14 = vector.broadcast %13 : vector<8x1xf32> to vector<8x1024xf32>
    %15 = arith.mulf %14, %12 : vector<8x1024xf32>
    %16 = arith.addf %10, %15 : vector<8x1024xf32>
    %c3 = arith.constant 3 : index
    %c0_12 = arith.constant 0 : index
    %c0_13 = arith.constant 0 : index
    %17 = vector.load %arg3[%c3, %c0_12, %c0_13] : memref<4x8x1024xf32, #tpu.memory_space<vmem>>, vector<1x8x1024xf32>
    %18 = vector.shape_cast %17 : vector<1x8x1024xf32> to vector<8x1024xf32>
    %c0_14 = arith.constant 0 : index
    %c3_15 = arith.constant 3 : index
    %19 = vector.load %arg2[%c0_14, %c3_15] : memref<8x4xf32, #tpu.memory_space<vmem>>, vector<8x1xf32>
    %20 = vector.broadcast %19 : vector<8x1xf32> to vector<8x1024xf32>
    %21 = arith.mulf %20, %18 : vector<8x1024xf32>
    %22 = arith.addf %16, %21 : vector<8x1024xf32>
    %c0_16 = arith.constant 0 : index
    %c0_17 = arith.constant 0 : index
    %23 = vector.load %arg4[%c0_16, %c0_17] : memref<8x1024xf32, #tpu.memory_space<vmem>>, vector<8x1024xf32>
    tpu.vector_store %arg4[%c0_16, %c0_17], %22 {strides = array<i32>} : memref<8x1024xf32, #tpu.memory_space<vmem>>, vector<8x1024xf32>,
    return
  }
  func.func @transform_0(%arg0: i32, %arg1: i32) -> (i32, i32) {
    %c0_i32 = arith.constant 0 : i32
    %c0_i32_0 = arith.constant 0 : i32
    return %arg0, %c0_i32 : i32, i32
  }
  func.func @transform_1(%arg0: i32, %arg1: i32) -> (i32, i32, i32) {
    %c0_i32 = arith.constant 0 : i32
    %c0_i32_0 = arith.constant 0 : i32
    return %c0_i32, %arg0, %arg1 : i32, i32, i32
  }
  func.func @transform_2(%arg0: i32, %arg1: i32) -> (i32, i32) {
    %c0_i32 = arith.constant 0 : i32
    return %arg0, %arg1 : i32, i32
  }
}

</mosaic_0001>

<bundles_post_ra>
// kernel: tpu_custom_call.1
= control target key start
LH: loop header
LB: loop body
LE: loop exit
PB: predicated region body
PF: predicated region fallthrough
CT: control target
= control target key end

     0   :  { %7 = vsyncpa [#allocation3], 0  ;;  %s247_s0 = inlined_call_operand.vmem [shape: f32[8,4], index: 0, kind: input, shape index: {}]   ;;  %s248_s1 = inlined_call_operand.hbm [shape: f32[4,8,1024], index: 1, kind: input, shape index: {}]   ;;  %s249_s2 = inlined_call_operand.hbm [shape: f32[8,1024], index: 2, kind: output, shape index: {}]  }
   0x1   :  { %8 = vsyncpa [#allocation4], 0  ;;  %s215_s9 = smov [#allocation2]  }
   0x2   :  { %s16_s10 = sshll.u32 %s215_s9, 4  ;;  %s17_s10 = int_to_ptr.vmem [resolvable:$true] %s16_s10 }
   0x3   :  { %s179_s11 = scalar_lea.vmem %s17_s10, 4096  ;;  %p184_p1 = scmp.lt.s32.totalorder %s17_s10, %s17_s10 }
   0x4   :  { %p180_p0 = scmp.ne.s32.totalorder %s17_s10, %s179_s11  ;;  %p185_p2 = scmp.lt.s32.totalorder %s179_s11, %s179_s11 }
   0x6   :  { %p186_p3 = por %p185_p2, %p184_p1 }
   0x8   :  { %p187_p4 = pnand %p186_p3, %p180_p0 }
   0xa   :  { %190 = shalt.err (!%p187_p4)
}
   0xb   :  { %s216_s12 = smov 1024   ;;  %s217_s13 = smov 64  }
   0xc   :  { %22 = dma.hbm_to_vmem [thread:$0]  %s248_s1, 4096, %s17_s10, [#allocation3], %s216_s12, %s216_s12, %s217_s13  }
   0xd   :  { %211 = dma.done.wait [#allocation3], 4096  }
   0xe   :  { %212 = vsyncadd [#allocation3], 4294963200  ;;  %v218_v0 = vmov 0   ;;  %v219_v1 = vmov 2   ;;  %v34_v2 = vld [vmem:[%s247_s0] sm:$0xff]  ;;  %v220_v3 = vmov 1  }
   0xf   :  { %166 = vset.pattern.permute.xlu0 %v218_v0  ;;  %168 = vset.pattern.permute.xlu1 %v219_v1  ;;  %v221_v4 = vmov 3   ;;  %v78_v5 = vld [vmem:[#allocation2 + $0x80] sm:$0xff]  ;;  %v79_v6 = vld [vmem:[#allocation2 + $0x88] sm:$0xff]  ;;  %v80_v7 = vld [vmem:[#allocation2 + $0x90] sm:$0xff]  ;;  %s222_s0 = smov [#allocation5]  }
  0x10   :  { %37 = vperm.xlu0 %166, %v34_v2   ;;  %87 = vperm.xlu1 %168, %v34_v2   ;;  %v81_v8 = vld [vmem:[#allocation2 + $0x98] sm:$0xff]  ;;  %v82_v9 = vld [vmem:[#allocation2 + $0xa0] sm:$0xff]  ;;  %v83_v10 = vld [vmem:[#allocation2 + $0xa8] sm:$0xff]  ;;  %s149_s1 = sshll.u32 %s222_s0, 4  ;;  %s150_s1 = int_to_ptr.vmem [resolvable:$true] %s149_s1 }
  0x11   :  { %v84_v11 = vld [vmem:[#allocation2 + $0xb0] sm:$0xff]  ;;  %v85_v13 = vld [vmem:[#allocation2 + $0xb8] sm:$0xff]  ;;  %v26_v15 = vld [vmem:[#allocation2] sm:$0xff]  ;;  %s191_s18 = scalar_lea.vmem %s150_s1, 1024  ;;  %p196_p6 = scmp.lt.s32.totalorder %s150_s1, %s150_s1 }
  0x12   :  { %v27_v16 = vld [vmem:[#allocation2 + $0x8] sm:$0xff]  ;;  %v49_v17 = vld [vmem:[#allocation2 + $0x40] sm:$0xff]  ;;  %v28_v19 = vld [vmem:[#allocation2 + $0x10] sm:$0xff]  ;;  %p192_p5 = scmp.ne.s32.totalorder %s150_s1, %s191_s18  ;;  %p197_p7 = scmp.lt.s32.totalorder %s191_s18, %s191_s18 }
  0x13   :  { %v50_v18 = vld [vmem:[#allocation2 + $0x48] sm:$0xff]  ;;  %v29_v20 = vld [vmem:[#allocation2 + $0x18] sm:$0xff]  ;;  %v30_v21 = vld [vmem:[#allocation2 + $0x20] sm:$0xff] }
  0x14   :  { %167 = vset.pattern.permute.xlu0 %v220_v3  ;;  %169 = vset.pattern.permute.xlu1 %v221_v4  ;;  %v31_v26 = vld [vmem:[#allocation2 + $0x28] sm:$0xff]  ;;  %v32_v27 = vld [vmem:[#allocation2 + $0x30] sm:$0xff]  ;;  %v33_v28 = vld [vmem:[#allocation2 + $0x38] sm:$0xff]  ;;  %p198_p8 = por %p197_p7, %p196_p6 }
  0x15   :  { %58 = vperm.xlu0 %167, %v34_v2   ;;  %116 = vperm.xlu1 %169, %v34_v2   ;;  %v51_v33 = vld [vmem:[#allocation2 + $0x50] sm:$0xff]  ;;  %v52_v34 = vld [vmem:[#allocation2 + $0x58] sm:$0xff]  ;;  %v53_v35 = vld [vmem:[#allocation2 + $0x60] sm:$0xff] }
  0x16   :  { %v54_v36 = vld [vmem:[#allocation2 + $0x68] sm:$0xff]  ;;  %v55_v37 = vld [vmem:[#allocation2 + $0x70] sm:$0xff]  ;;  %v56_v38 = vld [vmem:[#allocation2 + $0x78] sm:$0xff]  ;;  %p199_p9 = pnand %p198_p8, %p192_p5 }
  0x17   :  { %v107_v60 = vld [vmem:[#allocation2 + $0xc0] sm:$0xff]  ;;  %v108_v61 = vld [vmem:[#allocation2 + $0xc8] sm:$0xff]  ;;  %v109_v2 = vld [vmem:[#allocation2 + $0xd0] sm:$0xff] }
  0x18   :  { %v110_v3 = vld [vmem:[#allocation2 + $0xd8] sm:$0xff] }
  0x19   :  { %170 = vset.pattern.permute.xlu0 %v221_v4  ;;  %v111_v4 = vld [vmem:[#allocation2 + $0xe0] sm:$0xff] }
  0x8b   :  { %v38_v12 = vpop.permute.xlu0 %37  ;;  %v88_v14 = vpop.permute.xlu1 %87 }
  0x8c   :  { %v90_v22 = vmul.f32 %v88_v14, %v78_v5  ;;  %v91_v23 = vmul.f32 %v88_v14, %v79_v6  ;;  %v92_v24 = vmul.f32 %v88_v14, %v80_v7  ;;  %v93_v25 = vmul.f32 %v88_v14, %v81_v8  ;;  %v112_v6 = vld [vmem:[#allocation2 + $0xe8] sm:$0xff]  ;;  %v113_v7 = vld [vmem:[#allocation2 + $0xf0] sm:$0xff]  ;;  %v114_v8 = vld [vmem:[#allocation2 + $0xf8] sm:$0xff] }
  0x8d   :  { %v94_v29 = vmul.f32 %v88_v14, %v82_v9  ;;  %v95_v30 = vmul.f32 %v88_v14, %v83_v10  ;;  %v96_v31 = vmul.f32 %v88_v14, %v84_v11  ;;  %v97_v32 = vmul.f32 %v88_v14, %v85_v13 }
  0x8e   :  { %v40_v39 = vmul.f32 %v38_v12, %v26_v15  ;;  %v41_v40 = vmul.f32 %v38_v12, %v27_v16  ;;  %v42_v41 = vmul.f32 %v38_v12, %v28_v19  ;;  %v43_v42 = vmul.f32 %v38_v12, %v29_v20 }
  0x8f   :  { %v44_v44 = vmul.f32 %v38_v12, %v30_v21  ;;  %v45_v45 = vmul.f32 %v38_v12, %v31_v26  ;;  %v46_v46 = vmul.f32 %v38_v12, %v32_v27  ;;  %v47_v47 = vmul.f32 %v38_v12, %v33_v28 }
  0x90   :  { %v59_v43 = vpop.permute.xlu0 %58  ;;  %v117_v5 = vpop.permute.xlu1 %116 }
  0x91   :  { %v61_v48 = vmul.f32 %v59_v43, %v49_v17  ;;  %v62_v49 = vmul.f32 %v59_v43, %v50_v18  ;;  %v63_v50 = vmul.f32 %v59_v43, %v51_v33  ;;  %v64_v51 = vmul.f32 %v59_v43, %v52_v34 }
  0x92   :  { %v65_v52 = vmul.f32 %v59_v43, %v53_v35  ;;  %v66_v53 = vmul.f32 %v59_v43, %v54_v36  ;;  %v67_v54 = vmul.f32 %v59_v43, %v55_v37  ;;  %v68_v55 = vmul.f32 %v59_v43, %v56_v38 }
  0x93   :  { %v69_v56 = vadd.f32 %v61_v48, %v40_v39  ;;  %v70_v57 = vadd.f32 %v62_v49, %v41_v40  ;;  %v71_v58 = vadd.f32 %v63_v50, %v42_v41  ;;  %v72_v59 = vadd.f32 %v64_v51, %v43_v42 }
  0x94   :  { %v73_v62 = vadd.f32 %v65_v52, %v44_v44  ;;  %v74_v63 = vadd.f32 %v66_v53, %v45_v45  ;;  %v75_v0 = vadd.f32 %v67_v54, %v46_v46  ;;  %v76_v1 = vadd.f32 %v68_v55, %v47_v47 }
  0x95   :  { %v98_v9 = vadd.f32 %v90_v22, %v69_v56  ;;  %v99_v10 = vadd.f32 %v91_v23, %v70_v57  ;;  %v100_v11 = vadd.f32 %v92_v24, %v71_v58  ;;  %v101_v12 = vadd.f32 %v93_v25, %v72_v59 }
  0x96   :  { %v102_v13 = vadd.f32 %v94_v29, %v73_v62  ;;  %v103_v14 = vadd.f32 %v95_v30, %v74_v63  ;;  %v104_v15 = vadd.f32 %v96_v31, %v75_v0  ;;  %v105_v16 = vadd.f32 %v97_v32, %v76_v1 }
  0x97   :  { %v119_v17 = vmul.f32 %v117_v5, %v107_v60  ;;  %v120_v18 = vmul.f32 %v117_v5, %v108_v61  ;;  %v121_v19 = vmul.f32 %v117_v5, %v109_v2  ;;  %v122_v20 = vmul.f32 %v117_v5, %v110_v3 }
  0x98   :  { %v123_v21 = vmul.f32 %v117_v5, %v111_v4  ;;  %v124_v26 = vmul.f32 %v117_v5, %v112_v6  ;;  %v125_v27 = vmul.f32 %v117_v5, %v113_v7  ;;  %v126_v28 = vmul.f32 %v117_v5, %v114_v8 }
  0x99   :  { %v127_v33 = vadd.f32 %v119_v17, %v98_v9  ;;  %v128_v34 = vadd.f32 %v120_v18, %v99_v10  ;;  %v129_v22 = vadd.f32 %v121_v19, %v100_v11  ;;  %v130_v23 = vadd.f32 %v122_v20, %v101_v12 }
  0x9a   :  { %v131_v24 = vadd.f32 %v123_v21, %v102_v13  ;;  %v132_v25 = vadd.f32 %v124_v26, %v103_v14  ;;  %v133_v29 = vadd.f32 %v125_v27, %v104_v15  ;;  %v134_v30 = vadd.f32 %v126_v28, %v105_v16 }
  0x9b   :  { %135 = vst [vmem:[#allocation5] sm:$0xff] %v127_v33  ;;  %136 = vst [vmem:[#allocation5 + $0x8] sm:$0xff] %v128_v34 }
  0x9c   :  { %137 = vst [vmem:[#allocation5 + $0x10] sm:$0xff] %v129_v22  ;;  %138 = vst [vmem:[#allocation5 + $0x18] sm:$0xff] %v130_v23 }
  0x9d   :  { %139 = vst [vmem:[#allocation5 + $0x20] sm:$0xff] %v131_v24  ;;  %140 = vst [vmem:[#allocation5 + $0x28] sm:$0xff] %v132_v25 }
  0x9e   :  { %141 = vst [vmem:[#allocation5 + $0x30] sm:$0xff] %v133_v29  ;;  %142 = vst [vmem:[#allocation5 + $0x38] sm:$0xff] %v134_v30 }
  0x9f   :  { %202 = shalt.err (!%p199_p9)
}
  0xa0   :  { %152 = dma.vmem_to_hbm [thread:$0]  %s150_s1, 1024, %s249_s2, [#allocation4]  }
  0xa1   :  { %213 = dma.done.wait [#allocation4], 1024  }
  0xa2   :  { %214 = vsyncadd [#allocation4], 4294966272 }
  0xa3   :  { %156 = vsyncpa [#allocation3], 1 }
  0xa4   :  { %157 = vsyncpa [#allocation4], 1 }

</bundles_post_ra>
